<compile_context>
chip_gen: v7x
topology: tpu7x:2x2x1
jax: 0.10.0
libtpu: 0.0.40
codegen_flags: <defaults>
</compile_context>

<pallas_src>
import functools

import jax
import jax.numpy as jnp
from jax import lax
from jax.experimental import pallas as pl
from jax.experimental.pallas import tpu as pltpu

LANES = 128
SUBLANES = 8
PACK = SUBLANES * LANES              # 1024: zero-copy fast path granularity
MAX_TILE_ROWS = 8192                 # 8192*128*4B = 4 MiB / f32 operand / buffer
CHUNK_ROWS = 512                     # in-kernel reduction sub-chunk (256 KiB f32)
SPLIT_MIN_ROWS = 4096                # keep >=2 grid steps above this (v7x 2-TC)
VMEM_LIMIT_BYTES = 32 * 1024 * 1024  # covers 2 ops x 2 bufs x 4 MiB + temps
_EPS = 1e-07


def _bce_partial_kernel(x_ref, t_ref, out_ref, *, w0, w1, n_valid, tile_rows,
                        chunk_rows, needs_mask, binary_targets):
    i = pl.program_id(0)
    nchunks = tile_rows // chunk_rows  # static

    def partial_sum(x_raw, t_raw, row0):
        rows_here = x_raw.shape[0]
        # Upcast in-VMEM on the VPU (no host-side astype copies needed).
        x = x_raw.astype(jnp.float32)
        t = t_raw.astype(jnp.float32)
        if needs_mask:
            row = lax.broadcasted_iota(jnp.int32, (rows_here, LANES), 0)
            lane = lax.broadcasted_iota(jnp.int32, (rows_here, LANES), 1)
            valid = (row0 + row) * LANES + lane < n_valid
            # Neutralize BEFORE the logs so padded / overhang lanes stay finite.
            x = jnp.where(valid, x, 0.5)
            t = jnp.where(valid, t, 0.0)
        x = jnp.clip(x, _EPS, 1.0 - _EPS)
        if binary_targets:
            # Opt-in single-log fast path (valid only for targets in {0, 1}):
            # halves EUP work, keeps v7x memory-bound.
            p = jnp.where(t >= 0.5, x, 1.0 - x)
            w = jnp.where(t >= 0.5, jnp.float32(w1), jnp.float32(w0))
            bce = -w * jnp.log(p)
        else:
            bce = -w1 * t * jnp.log(x) - (1.0 - t) * w0 * jnp.log(1.0 - x)
        if needs_mask:
            bce = jnp.where(valid, bce, 0.0)
        # (rows, 128) -> (8, 128): whole-vreg VPU adds, no cross-lane/XLU work.
        return bce.reshape(rows_here // SUBLANES, SUBLANES, LANES).sum(axis=0)

    if nchunks == 1:
        out_ref[...] = partial_sum(x_ref[...], t_ref[...], i * tile_rows)
    else:
        # Accumulator loop over sub-chunks: avoids materializing a
        # (tile_rows, 128) f32 temporary in VMEM at large tile sizes.
        def body(c, acc):
            start = pl.multiple_of(c * chunk_rows, chunk_rows)
            return acc + partial_sum(x_ref[pl.ds(start, chunk_rows), :],
                                     t_ref[pl.ds(start, chunk_rows), :],
                                     i * tile_rows + start)

        out_ref[...] = lax.fori_loop(
            0, nchunks, body, jnp.zeros((SUBLANES, LANES), jnp.float32))


def bce_loss_class_weighted(inp, target, weight=(0.3, 0.7), *,
                            binary_targets=False):
    """Class-weighted BCE, mean-reduced to a float32 scalar.

    The kernel is HBM-bandwidth-bound: prefer bf16 `inp` (and bf16/int8/bool
    `target`) at the caller for ~2x throughput — the kernel upcasts to f32 on
    the VPU internally, so no host-side astype is needed (or wanted).

    binary_targets=True enables a single-log fast path that is only valid
    when every target element is exactly 0 or 1 (default off to preserve
    exact soft-target semantics of the PyTorch module).
    """
    w0, w1 = float(weight[0]), float(weight[1])
    n = inp.size

    flat_x = inp.reshape(-1)      # free; keep original dtype
    flat_t = target.reshape(-1)

    if n % PACK != 0:
        # Rare unaligned path: a single O(n) pad (neutral values, masked in
        # kernel).  Still one kernel dispatch and no separate tail op.
        n_pad = pl.cdiv(n, PACK) * PACK
        flat_x = jnp.pad(flat_x, (0, n_pad - n),
                         constant_values=jnp.array(0.5, flat_x.dtype))
        flat_t = jnp.pad(flat_t, (0, n_pad - n),
                         constant_values=jnp.array(0, flat_t.dtype))

    x2 = flat_x.reshape(-1, LANES)   # zero-copy when n % 1024 == 0
    t2 = flat_t.reshape(-1, LANES)
    rows = x2.shape[0]               # multiple of 8

    # Tile sizing: as big as VMEM allows, but never collapse the grid to a
    # single step for medium inputs (keeps both v7x TensorCores busy).
    tile_rows = min(MAX_TILE_ROWS, rows)
    if rows >= SPLIT_MIN_ROWS and pl.cdiv(rows, tile_rows) < 2:
        tile_rows = pl.cdiv(pl.cdiv(rows, 2), SUBLANES) * SUBLANES
    if tile_rows > CHUNK_ROWS:
        tile_rows = (tile_rows // CHUNK_ROWS) * CHUNK_ROWS
    chunk_rows = CHUNK_ROWS if tile_rows > CHUNK_ROWS else tile_rows

    grid = pl.cdiv(rows, tile_rows)
    needs_mask = (grid * tile_rows != rows) or (n % PACK != 0)

    kernel = functools.partial(
        _bce_partial_kernel, w0=w0, w1=w1, n_valid=n,
        tile_rows=tile_rows, chunk_rows=chunk_rows,
        needs_mask=needs_mask, binary_targets=binary_targets)

    total_elems = rows * LANES
    cost = pl.CostEstimate(
        flops=9 * total_elems,
        transcendentals=(1 if binary_targets else 2) * total_elems,
        bytes_accessed=(total_elems * (jnp.dtype(x2.dtype).itemsize
                                       + jnp.dtype(t2.dtype).itemsize)
                        + grid * SUBLANES * LANES * 4),
    )

    in_blk = pl.BlockSpec((tile_rows, LANES), lambda i: (i, 0))

    partials = pl.pallas_call(
        kernel,
        out_shape=jax.ShapeDtypeStruct((grid * SUBLANES, LANES), jnp.float32),
        grid_spec=pltpu.PrefetchScalarGridSpec(
            num_scalar_prefetch=0,
            grid=(grid,),
            in_specs=[in_blk, in_blk],
            out_specs=pl.BlockSpec((SUBLANES, LANES), lambda i: (i, 0)),
        ),
        compiler_params=pltpu.CompilerParams(
            dimension_semantics=("parallel",),
            vmem_limit_bytes=VMEM_LIMIT_BYTES,
        ),
        cost_estimate=cost,
    )(x2, t2)

    # Tiny (grid*8, 128) reduction + 1/N in the wrapper.
    return jnp.sum(partials) / jnp.float32(n)


def _reference(inp, target, weight=(0.3, 0.7)):
    x = jnp.clip(inp.astype(jnp.float32), _EPS, 1.0 - _EPS)
    t = target.astype(jnp.float32)
    bce = -weight[1] * t * jnp.log(x) - (1.0 - t) * weight[0] * jnp.log(1.0 - x)
    return jnp.mean(bce)


if __name__ == "__main__":
    key = jax.random.PRNGKey(0)
    k1, k2 = jax.random.split(key)

    # Small NCHW-like shapes: batch=2, channels=4, spatial=16x16
    shape = (2, 4, 16, 16)
    inp = jax.random.uniform(k1, shape, dtype=jnp.float32)               # probs in [0,1)
    target = (jax.random.uniform(k2, shape) > 0.5).astype(jnp.float32)   # binary targets

    weight = (0.3, 0.7)  # module's forward indexes weight[0] / weight[1]

    loss = bce_loss_class_weighted(inp, target, weight)
    loss = jax.block_until_ready(loss)

    ref = _reference(inp, target, weight)
    assert jnp.allclose(loss, ref, rtol=1e-5, atol=1e-6), (loss, ref)

    # Also exercise an unaligned size (pad + mask path) for safety.
    inp2 = jax.random.uniform(k1, (3, 5, 7), dtype=jnp.float32)
    tgt2 = (jax.random.uniform(k2, (3, 5, 7)) > 0.5).astype(jnp.float32)
    loss2 = jax.block_until_ready(bce_loss_class_weighted(inp2, tgt2, weight))
    ref2 = _reference(inp2, tgt2, weight)
    assert jnp.allclose(loss2, ref2, rtol=1e-5, atol=1e-6), (loss2, ref2)

    print("KERNEL_OK")
</pallas_src>

<mosaic_0001>
module attributes {stable_mosaic.version = 11 : i64} {
  func.func @_bce_partial_kernel(%arg0: i32, %arg1: memref<16x128xf32, #tpu.memory_space<vmem>>, %arg2: memref<16x128xf32, #tpu.memory_space<vmem>>, %arg3: memref<8x128xf32, #tpu.memory_space<vmem>>) attributes {dimension_semantics = [#tpu.dimension_semantics<parallel>], iteration_bounds = array<i64: 1>, scalar_prefetch = 0 : i64, scratch_operands = 0 : i64, tpu.core_type = #tpu.core_type<tc>, window_params = [{transform_indices = @transform_0, window_bounds = array<i64: 16, 128>}, {transform_indices = @transform_1, window_bounds = array<i64: 16, 128>}, {transform_indices = @transform_2, window_bounds = array<i64: 8, 128>}]} {
    %c0 = arith.constant 0 : index
    %c0_0 = arith.constant 0 : index
    %0 = vector.load %arg1[%c0, %c0_0] : memref<16x128xf32, #tpu.memory_space<vmem>>, vector<16x128xf32>
    %c0_1 = arith.constant 0 : index
    %c0_2 = arith.constant 0 : index
    %1 = vector.load %arg2[%c0_1, %c0_2] : memref<16x128xf32, #tpu.memory_space<vmem>>, vector<16x128xf32>
    %cst = arith.constant 1.000000e-07 : f32
    %cst_3 = arith.constant 0.99999988 : f32
    %2 = vector.broadcast %cst : f32 to vector<16x128xf32>
    %3 = arith.maximumf %2, %0 : vector<16x128xf32>
    %4 = vector.broadcast %cst_3 : f32 to vector<16x128xf32>
    %5 = arith.minimumf %4, %3 : vector<16x128xf32>
    %cst_4 = arith.constant -0.699999988 : f32
    %6 = vector.broadcast %cst_4 : f32 to vector<16x128xf32>
    %7 = arith.mulf %6, %1 : vector<16x128xf32>
    %8 = math.log %5 : vector<16x128xf32>
    %9 = arith.mulf %7, %8 : vector<16x128xf32>
    %cst_5 = arith.constant 1.000000e+00 : f32
    %10 = vector.broadcast %cst_5 : f32 to vector<16x128xf32>
    %11 = arith.subf %10, %1 : vector<16x128xf32>
    %cst_6 = arith.constant 3.000000e-01 : f32
    %12 = vector.broadcast %cst_6 : f32 to vector<16x128xf32>
    %13 = arith.mulf %11, %12 : vector<16x128xf32>
    %cst_7 = arith.constant 1.000000e+00 : f32
    %14 = vector.broadcast %cst_7 : f32 to vector<16x128xf32>
    %15 = arith.subf %14, %5 : vector<16x128xf32>
    %16 = math.log %15 : vector<16x128xf32>
    %17 = arith.mulf %13, %16 : vector<16x128xf32>
    %18 = arith.subf %9, %17 : vector<16x128xf32>
    %19 = vector.shape_cast %18 : vector<16x128xf32> to vector<2x8x128xf32>
    %cst_8 = arith.constant dense<0.000000e+00> : vector<8x128xf32>
    %20 = vector.multi_reduction <add>, %19, %cst_8 [0] : vector<2x8x128xf32> to vector<8x128xf32>
    %c0_9 = arith.constant 0 : index
    %c0_10 = arith.constant 0 : index
    %21 = vector.load %arg3[%c0_9, %c0_10] : memref<8x128xf32, #tpu.memory_space<vmem>>, vector<8x128xf32>
    tpu.vector_store %arg3[%c0_9, %c0_10], %20 {strides = array<i32>} : memref<8x128xf32, #tpu.memory_space<vmem>>, vector<8x128xf32>,
    return
  }
  func.func @transform_0(%arg0: i32) -> (i32, i32) {
    %c0_i32 = arith.constant 0 : i32
    %c0_i32_0 = arith.constant 0 : i32
    return %arg0, %c0_i32 : i32, i32
  }
  func.func @transform_1(%arg0: i32) -> (i32, i32) {
    %c0_i32 = arith.constant 0 : i32
    %c0_i32_0 = arith.constant 0 : i32
    return %arg0, %c0_i32 : i32, i32
  }
  func.func @transform_2(%arg0: i32) -> (i32, i32) {
    %c0_i32 = arith.constant 0 : i32
    %c0_i32_0 = arith.constant 0 : i32
    return %arg0, %c0_i32 : i32, i32
  }
}

</mosaic_0001>

<bundles_post_ra>
// kernel: tpu_custom_call.1
= control target key start
LH: loop header
LB: loop body
LE: loop exit
PB: predicated region body
PF: predicated region fallthrough
CT: control target
= control target key end

     0   :  { %7 = vsyncpa [#allocation3], 0  ;;  %s229_s0 = inlined_call_operand.hbm [shape: f32[16,128], index: 0, kind: input, shape index: {}]   ;;  %s230_s1 = inlined_call_operand.hbm [shape: f32[16,128], index: 1, kind: input, shape index: {}]   ;;  %s231_s2 = inlined_call_operand.hbm [shape: f32[8,128], index: 2, kind: output, shape index: {}]  }
   0x1   :  { %8 = vsyncpa [#allocation6], 0 }
   0x2   :  { %9 = vsyncpa [#allocation4], 0  ;;  %s173_s9 = smov [#allocation2]   ;;  %s101_s13 = scalar_lea.hbm %s229_s0, 256 }
   0x3   :  { %s15_s10 = sshll.u32 %s173_s9, 4  ;;  %p102_p0 = scmp.ne.s32.totalorder %s229_s0, %s101_s13  ;;  %s16_s10 = int_to_ptr.vmem [resolvable:$true] %s15_s10 }
   0x4   :  { %p105_p1 = scmp.lt.u32.totalorder %s101_s13, %s229_s0 }
   0x6   :  { %p107_p2 = pnand %p105_p1, %p102_p0 }
   0x8   :  { %110 = shalt.err (!%p107_p2)
}
   0x9   :  { %s111_s18 = scalar_lea.vmem %s16_s10, 256  ;;  %p116_p4 = scmp.lt.s32.totalorder %s16_s10, %s16_s10 }
   0xa   :  { %p112_p3 = scmp.ne.s32.totalorder %s16_s10, %s111_s18  ;;  %p117_p5 = scmp.lt.s32.totalorder %s111_s18, %s111_s18 }
   0xc   :  { %p118_p6 = por %p117_p5, %p116_p4 }
   0xe   :  { %p119_p7 = pnand %p118_p6, %p112_p3 }
  0x10   :  { %122 = shalt.err (!%p119_p7)
}
  0x11   :  { %s174_s19 = smov 128   ;;  %s175_s20 = smov 8  }
  0x12   :  { %21 = dma.hbm_to_vmem [thread:$0]  %s229_s0, 256, %s16_s10, [#allocation3], %s174_s19, %s174_s19, %s175_s20  }
  0x13   :  { %s176_s23 = smov [#allocation5]   ;;  %s123_s27 = scalar_lea.hbm %s230_s1, 256 }
  0x14   :  { %s27_s24 = sshll.u32 %s176_s23, 4  ;;  %p124_p8 = scmp.ne.s32.totalorder %s230_s1, %s123_s27  ;;  %s28_s24 = int_to_ptr.vmem [resolvable:$true] %s27_s24 }
  0x15   :  { %p127_p9 = scmp.lt.u32.totalorder %s123_s27, %s230_s1 }
  0x17   :  { %p129_p10 = pnand %p127_p9, %p124_p8 }
  0x19   :  { %132 = shalt.err (!%p129_p10)
}
  0x1a   :  { %s133_s4 = scalar_lea.vmem %s28_s24, 256  ;;  %p138_p12 = scmp.lt.s32.totalorder %s28_s24, %s28_s24 }
  0x1b   :  { %p134_p11 = scmp.ne.s32.totalorder %s28_s24, %s133_s4  ;;  %p139_p13 = scmp.lt.s32.totalorder %s133_s4, %s133_s4 }
  0x1d   :  { %p140_p0 = por %p139_p13, %p138_p12 }
  0x1f   :  { %p141_p1 = pnand %p140_p0, %p134_p11 }
  0x21   :  { %144 = shalt.err (!%p141_p1)
}
  0x22   :  { %33 = dma.hbm_to_vmem [thread:$0]  %s230_s1, 256, %s28_s24, [#allocation6], %s174_s19, %s174_s19, %s175_s20  }
  0x23   :  { %167 = dma.done.wait [#allocation3], 256  }
  0x24   :  { %168 = vsyncadd [#allocation3], 4294967040 }
  0x25   :  { %169 = dma.done.wait [#allocation6], 256  }
  0x26   :  { %170 = vsyncadd [#allocation6], 4294967040  ;;  %v40_v0 = vld [vmem:[#allocation2] sm:$0xff]  ;;  %v41_v1 = vld [vmem:[#allocation2 + $0x8] sm:$0xff]  ;;  %s177_s1 = smov [#allocation7]  }
  0x27   :  { %v44_v2 = vmax.f32 %v40_v0, 1e-07  ;;  %v45_v3 = vmax.f32 %v41_v1, 1e-07  ;;  %v42_v8 = vld [vmem:[#allocation5] sm:$0xff]  ;;  %v43_v9 = vld [vmem:[#allocation5 + $0x8] sm:$0xff] }
  0x28   :  { %v56_v10 = vsub.f32 1.0, %v42_v8  ;;  %v57_v11 = vsub.f32 1.0, %v43_v9  ;;  %v48_v12 = vmul.f32 -0.7, %v42_v8  ;;  %v49_v14 = vmul.f32 -0.7, %v43_v9 }
  0x29   :  { %v46_v4 = vmin.f32 %v44_v2, 0.9999999  ;;  %v47_v5 = vmin.f32 %v45_v3, 0.9999999  ;;  %s78_s6 = sshll.u32 %s177_s1, 4  ;;  %s79_s6 = int_to_ptr.vmem [resolvable:$true] %s78_s6 }
  0x2a   :  { %v58_v17 = vmul.f32 0.3, %v56_v10  ;;  %v59_v20 = vmul.f32 0.3, %v57_v11  ;;  %s145_s7 = scalar_lea.vmem %s79_s6, 128  ;;  %p150_p3 = scmp.lt.s32.totalorder %s79_s6, %s79_s6 }
  0x2b   :  { %93 = vlog2.f32 %v46_v4  ;;  %v60_v6 = vsub.f32 1.0, %v46_v4  ;;  %v61_v7 = vsub.f32 1.0, %v47_v5  ;;  %p146_p2 = scmp.ne.s32.totalorder %s79_s6, %s145_s7  ;;  %p151_p4 = scmp.lt.s32.totalorder %s145_s7, %s145_s7 }
  0x2c   :  { %95 = vlog2.f32 %v47_v5 }
  0x2d   :  { %97 = vlog2.f32 %v60_v6  ;;  %p152_p5 = por %p151_p4, %p150_p3 }
  0x2e   :  { %99 = vlog2.f32 %v61_v7 }
  0x2f   :  { %p153_p6 = pnand %p152_p5, %p146_p2 }
  0x35   :  { %v94_v13 = vpop.eup %93 }
  0x36   :  { %v96_v15 = vpop.eup %95  ;;  %v51_v16 = vmul.f32 0.6931472, %v94_v13 }
  0x37   :  { %v98_v18 = vpop.eup %97  ;;  %v53_v19 = vmul.f32 0.6931472, %v96_v15 }
  0x38   :  { %v100_v21 = vpop.eup %99  ;;  %v54_v22 = vmul.f32 %v51_v16, %v48_v12  ;;  %v63_v23 = vmul.f32 0.6931472, %v98_v18 }
  0x39   :  { %v55_v24 = vmul.f32 %v53_v19, %v49_v14  ;;  %v65_v25 = vmul.f32 0.6931472, %v100_v21 }
  0x3a   :  { %v66_v26 = vmul.f32 %v63_v23, %v58_v17 }
  0x3b   :  { %v67_v27 = vmul.f32 %v65_v25, %v59_v20 }
  0x3c   :  { %v68_v28 = vsub.f32 %v54_v22, %v66_v26 }
  0x3d   :  { %v69_v29 = vsub.f32 %v55_v24, %v67_v27 }
  0x3f   :  { %v70_v30 = vadd.f32 %v69_v29, %v68_v28 }
  0x41   :  { %71 = vst [vmem:[#allocation7] sm:$0xff] %v70_v30 }
  0x42   :  { %156 = shalt.err (!%p153_p6)
}
  0x43   :  { %s157_s10 = scalar_lea.hbm %s231_s2, 128 }
  0x44   :  { %p158_p7 = scmp.ne.s32.totalorder %s231_s2, %s157_s10  ;;  %p161_p8 = scmp.lt.u32.totalorder %s157_s10, %s231_s2 }
  0x46   :  { %p163_p9 = pnand %p161_p8, %p158_p7 }
  0x48   :  { %166 = shalt.err (!%p163_p9)
}
  0x49   :  { %81 = dma.vmem_to_hbm [thread:$0]  %s79_s6, 128, %s231_s2, [#allocation4]  }
  0x4a   :  { %171 = dma.done.wait [#allocation4], 128  }
  0x4b   :  { %172 = vsyncadd [#allocation4], 4294967168 }
  0x4c   :  { %85 = vsyncpa [#allocation3], 1 }
  0x4d   :  { %86 = vsyncpa [#allocation6], 1 }
  0x4e   :  { %87 = vsyncpa [#allocation4], 1 }

</bundles_post_ra>
